<compile_context>
chip_gen: v7x
topology: tpu7x:2x2x1
jax: 0.10.0
libtpu: 0.0.40
codegen_flags: <defaults>
</compile_context>

<pallas_src>
import functools

import jax
import jax.numpy as jnp
from jax import lax
from jax.experimental import pallas as pl
from jax.experimental.pallas import tpu as pltpu

_BANK = 128          # lane-bank width for the packed head output
_NEG = -1.0e30       # padding bias -> softmax prob / sigmoid of padding == 0


def _round_up(x, m):
    return (x + m - 1) // m * m


# -----------------------------------------------------------------------------
# Kernel 1: pixel normalization fused with global spatial mean pool
# -----------------------------------------------------------------------------
def _normpool_kernel(img_ref, mean_ref, inv_std_ref, pooled_ref, acc_ref, *, inv_count):
    j = pl.program_id(1)

    @pl.when(j == 0)
    def _init():
        acc_ref[...] = jnp.zeros_like(acc_ref)

    acc_ref[...] += jnp.sum(img_ref[...], axis=-1, keepdims=True)

    @pl.when(j == pl.num_programs(1) - 1)
    def _finish():
        # mean over true H*W pixels, then (mean - pixel_mean) * inv_std
        pooled_ref[...] = (acc_ref[...] * inv_count - mean_ref[...]) * inv_std_ref[...]


def normalize_pool(images_nchw, pixel_mean, pixel_std, *, spatial_tile=2048):
    """Returns the spatial mean of the normalized image, shape (B, C)."""
    B, C, H, W = images_nchw.shape
    S = H * W
    R = B * C

    R_pad = _round_up(R, 8)
    S_128 = _round_up(S, 128)
    s_tile = min(S_128, spatial_tile)
    S_pad = _round_up(S_128, s_tile)
    r_tile = 8
    for cand in (256, 128, 64, 32, 16, 8):
        if R_pad % cand == 0:
            r_tile = cand
            break

    # Lane-dense layout: rows = (b, c), lanes = spatial.
    img2d = images_nchw.astype(jnp.float32).reshape(R, S)
    img2d = jnp.pad(img2d, ((0, R_pad - R), (0, S_pad - S)))

    mean_rows = jnp.tile(pixel_mean.astype(jnp.float32).reshape(C), (B,))
    inv_std_rows = 1.0 / jnp.tile(pixel_std.astype(jnp.float32).reshape(C), (B,))
    mean_rows = jnp.pad(mean_rows, (0, R_pad - R)).reshape(R_pad, 1)
    inv_std_rows = jnp.pad(inv_std_rows, (0, R_pad - R),
                           constant_values=1.0).reshape(R_pad, 1)

    # TODO(synk): padded image regions (NestedTensor masks) are not excluded from
    # the spatial mean; matches this synthetic stub, not the full reference model.
    kernel = functools.partial(_normpool_kernel, inv_count=1.0 / float(S))
    pooled = pl.pallas_call(
        kernel,
        out_shape=jax.ShapeDtypeStruct((R_pad, 1), jnp.float32),
        grid_spec=pltpu.PrefetchScalarGridSpec(
            num_scalar_prefetch=0,
            grid=(R_pad // r_tile, S_pad // s_tile),
            in_specs=[
                pl.BlockSpec((r_tile, s_tile), lambda i, j: (i, j)),
                pl.BlockSpec((r_tile, 1), lambda i, j: (i, 0)),
                pl.BlockSpec((r_tile, 1), lambda i, j: (i, 0)),
            ],
            out_specs=pl.BlockSpec((r_tile, 1), lambda i, j: (i, 0)),
            scratch_shapes=[pltpu.VMEM((r_tile, 1), jnp.float32)],
        ),
        compiler_params=pltpu.CompilerParams(
            dimension_semantics=("parallel", "arbitrary"),
            vmem_limit_bytes=32 * 1024 * 1024,
        ),
    )(img2d, mean_rows, inv_std_rows)

    return pooled[:R, 0].reshape(B, C)


# -----------------------------------------------------------------------------
# Kernel 2: fused synthetic HOI head + hoi_inference post-processing
# -----------------------------------------------------------------------------
def _fused_head_post_kernel(pooled_ref, proj_ref, w_ref, qwb_ref, scale_ref,
                            verb_ref, hoi_ref, sub_ref, obj_ref, score_ref,
                            *, num_obj_fg):
    # --- head: feat @ W + (qemb @ W + b)   (single 2-D MXU matmul per batch) ---
    feat = jnp.dot(pooled_ref[0], proj_ref[...],
                   preferred_element_type=jnp.float32)            # (1, D)
    head = jnp.dot(feat, w_ref[...],
                   preferred_element_type=jnp.float32)            # (1, 4*128)
    q_out = qwb_ref[...] + head                                   # (Q, 4*128)

    # 128-aligned lane banks (pure vreg selects, no relayout)
    obj_logits = q_out[:, 0 * _BANK:1 * _BANK]                    # (Q, 128)
    verb_logits = q_out[:, 1 * _BANK:2 * _BANK]
    sub_raw = q_out[:, 2 * _BANK:3 * _BANK]
    obj_raw = q_out[:, 3 * _BANK:4 * _BANK]

    col = lax.broadcasted_iota(jnp.int32, obj_logits.shape, 1)    # (Q, 128)

    # --- object softmax -> max / argmax over foreground classes ---------------
    m = jnp.max(obj_logits, axis=-1, keepdims=True)
    e = jnp.exp(obj_logits - m)                                   # padded lanes -> 0
    inv_denom = pl.reciprocal(jnp.sum(e, axis=-1, keepdims=True))
    fg = col < num_obj_fg                                         # drop "no-object"
    e_fg = jnp.where(fg, e, -1.0)
    max_e = jnp.max(e_fg, axis=-1, keepdims=True)
    obj_scores = max_e * inv_denom                                # (Q, 1)
    labels = jnp.min(jnp.where((e_fg >= max_e) & fg, col, _BANK),
                     axis=-1, keepdims=True).astype(jnp.float32)  # first argmax

    # --- verb / pair scores (padded lanes are exactly 0) -----------------------
    verb_scores = jax.nn.sigmoid(verb_logits)                     # (Q, 128)
    verb_ref[...] = verb_scores[None]
    hoi_ref[...] = (verb_scores * obj_scores)[None]

    # --- boxes: sigmoid -> cxcywh -> xyxy -> scale (VPU/XLU only, no MXU) ------
    scale_vec = scale_ref[0]                                      # (1, 128): [w,h,w,h,0..]

    def _boxes(raw):
        b = jax.nn.sigmoid(raw)                                   # (Q, 128)

        def lane(i):  # extract lane i as (Q, 1) via masked lane-reduce
            return jnp.sum(jnp.where(col == i, b, 0.0), axis=-1, keepdims=True)

        cx, cy, bw, bh = lane(0), lane(1), lane(2), lane(3)
        x0 = cx - 0.5 * bw
        y0 = cy - 0.5 * bh
        x1 = cx + 0.5 * bw
        y1 = cy + 0.5 * bh
        xyxy = (jnp.where(col == 0, x0, 0.0) + jnp.where(col == 1, y0, 0.0)
                + jnp.where(col == 2, x1, 0.0) + jnp.where(col == 3, y1, 0.0))
        return xyxy * scale_vec                                   # zeros past lane 3

    sub_ref[...] = _boxes(sub_raw)[None]
    obj_ref[...] = _boxes(obj_raw)[None]

    # --- packed scalar outputs: lane 0 = obj_score, lane 1 = obj_label --------
    score_ref[...] = (jnp.where(col == 0, obj_scores, 0.0)
                      + jnp.where(col == 1, labels, 0.0))[None]


def hoi_head_and_postprocess(pooled, proj, qemb, w_head, b_head, orig_sizes,
                             num_obj_classes, num_verb_classes):
    B, C = pooled.shape
    Q, D = qemb.shape
    NO1 = num_obj_classes + 1
    NV = num_verb_classes

    # Pack head weight columns into four 128-wide lane banks:
    #   bank0 obj logits | bank1 verb logits | bank2 sub box | bank3 obj box
    w_pad = jnp.zeros((D, 4 * _BANK), jnp.float32)
    w_pad = w_pad.at[:, 0:NO1].set(w_head[:, :NO1])
    w_pad = w_pad.at[:, _BANK:_BANK + NV].set(w_head[:, NO1:NO1 + NV])
    w_pad = w_pad.at[:, 2 * _BANK:2 * _BANK + 4].set(w_head[:, NO1 + NV:NO1 + NV + 4])
    w_pad = w_pad.at[:, 3 * _BANK:3 * _BANK + 4].set(w_head[:, NO1 + NV + 4:NO1 + NV + 8])

    # (feat + qemb) @ W + b == feat @ W + (qemb @ W + b): query term precomputed
    # once (parameter-only). Logit-bank padding gets -1e30 so softmax/sigmoid of
    # padded lanes is exactly 0; box banks pad with 0.
    qwb_small = qemb @ w_head + b_head                            # (Q, N_head)
    qwb = jnp.full((Q, 4 * _BANK), _NEG, jnp.float32)
    qwb = qwb.at[:, 2 * _BANK:].set(0.0)
    qwb = qwb.at[:, 0:NO1].set(qwb_small[:, :NO1])
    qwb = qwb.at[:, _BANK:_BANK + NV].set(qwb_small[:, NO1:NO1 + NV])
    qwb = qwb.at[:, 2 * _BANK:2 * _BANK + 4].set(qwb_small[:, NO1 + NV:NO1 + NV + 4])
    qwb = qwb.at[:, 3 * _BANK:3 * _BANK + 4].set(qwb_small[:, NO1 + NV + 4:NO1 + NV + 8])

    # orig_sizes rows are (h, w)  ->  scale_fct = [w, h, w, h]
    img_h = orig_sizes[:, 0].astype(jnp.float32)
    img_w = orig_sizes[:, 1].astype(jnp.float32)
    scale = jnp.stack([img_w, img_h, img_w, img_h], axis=1)       # (B, 4)
    scale_slab = jnp.zeros((B, 1, _BANK), jnp.float32).at[:, 0, :4].set(scale)

    pooled3 = pooled.reshape(B, 1, C)

    kernel = functools.partial(_fused_head_post_kernel, num_obj_fg=num_obj_classes)
    out_shapes = tuple(jax.ShapeDtypeStruct((B, Q, _BANK), jnp.float32)
                       for _ in range(5))
    out_spec = pl.BlockSpec((1, Q, _BANK), lambda b: (b, 0, 0))

    verb_p, hoi_p, sub_p, obj_p, score_p = pl.pallas_call(
        kernel,
        out_shape=out_shapes,
        grid_spec=pltpu.PrefetchScalarGridSpec(
            num_scalar_prefetch=0,
            grid=(B,),
            in_specs=[
                pl.BlockSpec((1, 1, C), lambda b: (b, 0, 0)),
                pl.BlockSpec((C, D), lambda b: (0, 0)),
                pl.BlockSpec((D, 4 * _BANK), lambda b: (0, 0)),
                pl.BlockSpec((Q, 4 * _BANK), lambda b: (0, 0)),
                pl.BlockSpec((1, 1, _BANK), lambda b: (b, 0, 0)),
            ],
            out_specs=[out_spec] * 5,
        ),
        compiler_params=pltpu.CompilerParams(dimension_semantics=("parallel",)),
    )(pooled3, proj, w_pad, qwb, scale_slab)

    return {
        "obj_scores": score_p[..., 0],
        "obj_labels": score_p[..., 1].astype(jnp.int32),
        "verb_scores": verb_p[..., :NV],
        "sub_boxes": sub_p[..., :4],
        "obj_boxes": obj_p[..., :4],
        "hoi_scores": hoi_p[..., :NV],
    }


# -----------------------------------------------------------------------------
# End-to-end wrapper (mirrors CDNHOI.hoi_inference compute path)
# -----------------------------------------------------------------------------
def cdnhoi_forward(images_nchw, orig_sizes, params):
    pooled = normalize_pool(images_nchw, params["pixel_mean"], params["pixel_std"])
    return hoi_head_and_postprocess(
        pooled, params["proj"], params["qemb"], params["w_head"], params["b_head"],
        orig_sizes, params["num_obj_classes"], params["num_verb_classes"])


# -----------------------------------------------------------------------------
# Pure-JAX reference for correctness checking
# -----------------------------------------------------------------------------
def _reference_forward(images, orig_sizes, params):
    B, C, H, W = images.shape
    mean = params["pixel_mean"].reshape(1, C, 1, 1)
    std = params["pixel_std"].reshape(1, C, 1, 1)
    norm = (images - mean) / std
    pooled = norm.mean(axis=(2, 3))                               # (B, C)
    feat = pooled @ params["proj"]                                # (B, D)
    q = feat[:, None, :] + params["qemb"][None]                   # (B, Q, D)
    head = q @ params["w_head"] + params["b_head"]                # (B, Q, N)
    NO1 = params["num_obj_classes"] + 1
    NV = params["num_verb_classes"]
    obj_logits = head[..., :NO1]
    verb_logits = head[..., NO1:NO1 + NV]
    sub_b = jax.nn.sigmoid(head[..., NO1 + NV:NO1 + NV + 4])
    obj_b = jax.nn.sigmoid(head[..., NO1 + NV + 4:NO1 + NV + 8])
    prob = jax.nn.softmax(obj_logits, axis=-1)
    obj_scores = prob[..., :-1].max(-1)
    obj_labels = prob[..., :-1].argmax(-1).astype(jnp.int32)
    verb_scores = jax.nn.sigmoid(verb_logits)
    img_h = orig_sizes[:, 0].astype(jnp.float32)
    img_w = orig_sizes[:, 1].astype(jnp.float32)
    scale = jnp.stack([img_w, img_h, img_w, img_h], axis=1)[:, None, :]

    def cxcywh_to_xyxy(b):
        cx, cy, bw, bh = b[..., 0], b[..., 1], b[..., 2], b[..., 3]
        return jnp.stack([cx - 0.5 * bw, cy - 0.5 * bh,
                          cx + 0.5 * bw, cy + 0.5 * bh], axis=-1)

    return {
        "obj_scores": obj_scores,
        "obj_labels": obj_labels,
        "verb_scores": verb_scores,
        "sub_boxes": cxcywh_to_xyxy(sub_b) * scale,
        "obj_boxes": cxcywh_to_xyxy(obj_b) * scale,
        "hoi_scores": verb_scores * obj_scores[..., None],
    }


if __name__ == "__main__":
    key = jax.random.PRNGKey(0)
    B, C, H, W = 2, 3, 16, 16
    Q, D = 8, 32
    NUM_OBJ = 7          # foreground object classes (+1 no-object column)
    NUM_VERB = 6
    N_HEAD = (NUM_OBJ + 1) + NUM_VERB + 4 + 4

    k_img, k_proj, k_qemb, k_w, k_b = jax.random.split(key, 5)
    images = jax.random.uniform(k_img, (B, C, H, W), jnp.float32, 0.0, 255.0)
    orig_sizes = jnp.array([[H, W], [H, W]], dtype=jnp.float32)   # rows are (h, w)

    params = {
        "pixel_mean": jnp.array([123.675, 116.28, 103.53], dtype=jnp.float32),
        "pixel_std": jnp.array([58.395, 57.12, 57.375], dtype=jnp.float32),
        "proj": 0.1 * jax.random.normal(k_proj, (C, D), jnp.float32),
        "qemb": 0.1 * jax.random.normal(k_qemb, (Q, D), jnp.float32),
        "w_head": 0.1 * jax.random.normal(k_w, (D, N_HEAD), jnp.float32),
        "b_head": 0.01 * jax.random.normal(k_b, (1, N_HEAD), jnp.float32),
        "num_obj_classes": NUM_OBJ,
        "num_verb_classes": NUM_VERB,
    }

    out = jax.block_until_ready(cdnhoi_forward(images, orig_sizes, params))
    ref = jax.block_until_ready(_reference_forward(images, orig_sizes, params))

    assert out["obj_scores"].shape == (B, Q)
    assert out["obj_labels"].shape == (B, Q)
    assert out["verb_scores"].shape == (B, Q, NUM_VERB)
    assert out["sub_boxes"].shape == (B, Q, 4)
    assert out["obj_boxes"].shape == (B, Q, 4)
    assert out["hoi_scores"].shape == (B, Q, NUM_VERB)

    for name in ("obj_scores", "verb_scores", "sub_boxes", "obj_boxes", "hoi_scores"):
        assert jnp.allclose(out[name], ref[name], rtol=1e-3, atol=1e-3), name
    assert jnp.array_equal(out["obj_labels"], ref["obj_labels"])

    print("KERNEL_OK")
</pallas_src>

<mosaic_0001>
module attributes {stable_mosaic.version = 11 : i64} {
  func.func @_normpool_kernel(%arg0: i32, %arg1: i32, %arg2: memref<8x256xf32, #tpu.memory_space<vmem>>, %arg3: memref<8x1xf32, #tpu.memory_space<vmem>>, %arg4: memref<8x1xf32, #tpu.memory_space<vmem>>, %arg5: memref<8x1xf32, #tpu.memory_space<vmem>>, %arg6: memref<8x1xf32, #tpu.memory_space<vmem>>) attributes {dimension_semantics = [#tpu.dimension_semantics<parallel>, #tpu.dimension_semantics<arbitrary>], iteration_bounds = array<i64: 1, 1>, scalar_prefetch = 0 : i64, scratch_operands = 1 : i64, tpu.core_type = #tpu.core_type<tc>, window_params = [{transform_indices = @transform_0, window_bounds = array<i64: 8, 256>}, {transform_indices = @transform_1, window_bounds = array<i64: 8, 1>}, {transform_indices = @transform_2, window_bounds = array<i64: 8, 1>}, {transform_indices = @transform_3, window_bounds = array<i64: 8, 1>}]} {
    %c0_i32 = arith.constant 0 : i32
    %0 = arith.cmpi eq, %arg1, %c0_i32 : i32
    %1 = arith.extui %0 : i1 to i32
    %c0_i32_0 = arith.constant 0 : i32
    %2 = arith.cmpi ne, %1, %c0_i32_0 : i32
    scf.if %2 {
      %cst_8 = arith.constant 0.000000e+00 : f32
      %12 = vector.broadcast %cst_8 : f32 to vector<8x1xf32>
      %c0_9 = arith.constant 0 : index
      %c0_10 = arith.constant 0 : index
      %13 = vector.load %arg6[%c0_9, %c0_10] : memref<8x1xf32, #tpu.memory_space<vmem>>, vector<8x1xf32>
      tpu.vector_store %arg6[%c0_9, %c0_10], %12 {strides = array<i32>} : memref<8x1xf32, #tpu.memory_space<vmem>>, vector<8x1xf32>,
    } else {
    }
    %c0 = arith.constant 0 : index
    %c0_1 = arith.constant 0 : index
    %3 = vector.load %arg6[%c0, %c0_1] : memref<8x1xf32, #tpu.memory_space<vmem>>, vector<8x1xf32>
    %c0_2 = arith.constant 0 : index
    %c0_3 = arith.constant 0 : index
    %4 = vector.load %arg2[%c0_2, %c0_3] : memref<8x256xf32, #tpu.memory_space<vmem>>, vector<8x256xf32>
    %cst = arith.constant dense<0.000000e+00> : vector<8xf32>
    %5 = vector.multi_reduction <add>, %4, %cst [1] : vector<8x256xf32> to vector<8xf32>
    %6 = vector.shape_cast %5 : vector<8xf32> to vector<8x1xf32>
    %7 = arith.addf %3, %6 : vector<8x1xf32>
    %c0_4 = arith.constant 0 : index
    %c0_5 = arith.constant 0 : index
    %8 = vector.load %arg6[%c0_4, %c0_5] : memref<8x1xf32, #tpu.memory_space<vmem>>, vector<8x1xf32>
    tpu.vector_store %arg6[%c0_4, %c0_5], %7 {strides = array<i32>} : memref<8x1xf32, #tpu.memory_space<vmem>>, vector<8x1xf32>,
    %c0_i32_6 = arith.constant 0 : i32
    %9 = arith.cmpi eq, %arg1, %c0_i32_6 : i32
    %10 = arith.extui %9 : i1 to i32
    %c0_i32_7 = arith.constant 0 : i32
    %11 = arith.cmpi ne, %10, %c0_i32_7 : i32
    scf.if %11 {
      %c0_8 = arith.constant 0 : index
      %c0_9 = arith.constant 0 : index
      %12 = vector.load %arg6[%c0_8, %c0_9] : memref<8x1xf32, #tpu.memory_space<vmem>>, vector<8x1xf32>
      %cst_10 = arith.constant 3.906250e-03 : f32
      %13 = vector.broadcast %cst_10 : f32 to vector<8x1xf32>
      %14 = arith.mulf %12, %13 : vector<8x1xf32>
      %c0_11 = arith.constant 0 : index
      %c0_12 = arith.constant 0 : index
      %15 = vector.load %arg3[%c0_11, %c0_12] : memref<8x1xf32, #tpu.memory_space<vmem>>, vector<8x1xf32>
      %16 = arith.subf %14, %15 : vector<8x1xf32>
      %c0_13 = arith.constant 0 : index
      %c0_14 = arith.constant 0 : index
      %17 = vector.load %arg4[%c0_13, %c0_14] : memref<8x1xf32, #tpu.memory_space<vmem>>, vector<8x1xf32>
      %18 = arith.mulf %16, %17 : vector<8x1xf32>
      %c0_15 = arith.constant 0 : index
      %c0_16 = arith.constant 0 : index
      %19 = vector.load %arg5[%c0_15, %c0_16] : memref<8x1xf32, #tpu.memory_space<vmem>>, vector<8x1xf32>
      tpu.vector_store %arg5[%c0_15, %c0_16], %18 {strides = array<i32>} : memref<8x1xf32, #tpu.memory_space<vmem>>, vector<8x1xf32>,
    } else {
    }
    return
  }
  func.func @transform_0(%arg0: i32, %arg1: i32) -> (i32, i32) {
    %c0_i32 = arith.constant 0 : i32
    return %arg0, %arg1 : i32, i32
  }
  func.func @transform_1(%arg0: i32, %arg1: i32) -> (i32, i32) {
    %c0_i32 = arith.constant 0 : i32
    %c0_i32_0 = arith.constant 0 : i32
    return %arg0, %c0_i32 : i32, i32
  }
  func.func @transform_2(%arg0: i32, %arg1: i32) -> (i32, i32) {
    %c0_i32 = arith.constant 0 : i32
    %c0_i32_0 = arith.constant 0 : i32
    return %arg0, %c0_i32 : i32, i32
  }
  func.func @transform_3(%arg0: i32, %arg1: i32) -> (i32, i32) {
    %c0_i32 = arith.constant 0 : i32
    %c0_i32_0 = arith.constant 0 : i32
    return %arg0, %c0_i32 : i32, i32
  }
}

</mosaic_0001>

<bundles_post_ra>
// kernel: tpu_custom_call.1
= control target key start
LH: loop header
LB: loop body
LE: loop exit
PB: predicated region body
PF: predicated region fallthrough
CT: control target
= control target key end

     0   :  { %vm18_vm0 = vcmask 7168   ;;  %v44_v2 = vmov 0.0   ;;  %s83_s0 = inlined_call_operand.vmem [shape: f32[8,256], index: 0, kind: input, shape index: {}]   ;;  %s84_s1 = inlined_call_operand.vmem [shape: f32[8,1], index: 1, kind: input, shape index: {}]   ;;  %s85_s2 = inlined_call_operand.vmem [shape: f32[8,1], index: 2, kind: input, shape index: {}]   ;;  %s86_s3 = inlined_call_operand.vmem [shape: f32[8,1], index: 3, kind: output, shape index: {}]  }
   0x1   :  { %v21_v0 = vld [vmem:[%s83_s0] sm:$0xff]  ;;  %v22_v1 = vld [vmem:[%s83_s0 + $0x8] sm:$0xff]  ;;  %19 = vst.msk [vmem:[#allocation2] sm:$0xff] %vm18_vm0, %v44_v2 }
   0x2   :  { %v23_v3 = vadd.f32 %v22_v1, %v21_v0  ;;  %v34_v8 = vld [vmem:[%s84_s1] sm:$0xff] }
   0x3   :  { %v36_v10 = vld [vmem:[%s85_s2] sm:$0xff] }
   0x4   :  { %24 = vadd.xlane.f32.xlu0 %v23_v3 }
   0x8   :  { %v20_v4 = vld [vmem:[#allocation2] sm:$0xff] }
  0x91   :  { %v25_v5 = vpop.xlane.xlu0 %24 }
  0x92   :  { %v26_v6 = vadd.f32 %v25_v5, %v20_v4 }
  0x94   :  { %28 = vst.msk [vmem:[#allocation2] sm:$0xff] %vm18_vm0, %v26_v6 }
  0x9b   :  { %v32_v7 = vld [vmem:[#allocation2] sm:$0xff] }
  0x9c   :  { %v33_v9 = vmul.f32 0.00390625, %v32_v7 }
  0x9e   :  { %v35_v11 = vsub.f32 %v33_v9, %v34_v8 }
  0xa0   :  { %v37_v12 = vmul.f32 %v36_v10, %v35_v11 }
  0xa2   :  { %38 = vst.msk [vmem:[%s86_s3] sm:$0xff] %vm18_vm0, %v37_v12 }

</bundles_post_ra>
